<compile_context>
chip_gen: v5e
topology: v5e:2x2
jax: 0.10.0
libtpu: 0.0.40
codegen_flags: <defaults>
</compile_context>

<pallas_src>
import jax
import jax.numpy as jnp
from jax.experimental import pallas as pl
from jax.experimental.pallas import tpu as pltpu


def _round_up(n, m):
    return (n + m - 1) // m * m


def _mlp_kernel(x_ref, w1_ref, b1_ref, w2_ref, b2w3_ref, b3_ref, o_ref):
    # fc1 + ReLU : (TB, D) @ (D, Hp) -> (TB, Hp)
    h1 = jnp.dot(x_ref[...], w1_ref[...], preferred_element_type=jnp.float32)
    h1 = jnp.maximum(h1 + b1_ref[...], 0.0)

    # fc2 + ReLU : (TB, Hp) @ (Hp, 32) -> (TB, 32)
    h2 = jnp.dot(h1, w2_ref[...], preferred_element_type=jnp.float32)
    h2 = jnp.maximum(h2 + b2w3_ref[0:1, :], 0.0)

    # fc3 (32 -> 1): VPU multiply + lane reduce; batch stays on sublanes so the
    # result is natively a (TB, 1) column (no XLU relayout).  b3 from SMEM.
    y = jnp.sum(h2 * b2w3_ref[1:2, :], axis=-1, keepdims=True)      # (TB, 1)
    o_ref[...] = (y + b3_ref[0, 0]).astype(o_ref.dtype)


def prepare_params(params):
    """Pad / pack the weights once; reuse the result across forward calls.

    params: dict with w1 (dim,H), b1 (1,H), w2 (H,32), b2 (1,32), w3 (32,1),
            b3 (1,1) -- weights stored as (in_features, out_features)."""
    f32 = jnp.float32
    w1, b1 = params["w1"].astype(f32), params["b1"].astype(f32)
    w2, b2 = params["w2"].astype(f32), params["b2"].astype(f32)
    w3, b3 = params["w3"].astype(f32), params["b3"].astype(f32)

    dim, hidden = w1.shape
    k2 = w2.shape[1]                              # 32
    hp = _round_up(hidden, 128)                   # lane-align hidden only

    w1p = jnp.zeros((dim, hp), f32).at[:, :hidden].set(w1)
    b1p = jnp.zeros((1, hp), f32).at[:, :hidden].set(b1.reshape(1, hidden))
    w2p = jnp.zeros((hp, k2), f32).at[:hidden, :].set(w2)
    b2w3 = jnp.concatenate([b2.reshape(1, k2), w3.reshape(1, k2)], axis=0)  # (2, k2)
    b3p = b3.reshape(1, 1)
    return {"w1p": w1p, "b1p": b1p, "w2p": w2p, "b2w3": b2w3, "b3p": b3p,
            "dim": dim, "hp": hp, "k2": k2}


def network_forward(x, prepared, *, tb_max=2048):
    """Fused 3-layer MLP forward (NeuralUCB `Network`).

    x        : (batch, dim) float array
    prepared : output of prepare_params(params)
    returns  : (batch, 1) float32
    """
    assert tb_max % 128 == 0 and tb_max >= 128, "tb_max must be a multiple of 128"
    f32 = jnp.float32

    batch, dim = x.shape
    assert dim == prepared["dim"]
    hp, k2 = prepared["hp"], prepared["k2"]

    # Batch tile: a single tile for tiny batches; otherwise at least 2 tiles so
    # the "parallel" axis can shard across both v7x TensorCores.  Even at
    # tb=2048 the x tile + h1 temp is ~(2048*dim + 2048*128)*4 B -- well inside
    # v5e's 16 MiB default scoped VMEM for any reasonable dim.
    if batch <= 256:
        tb = _round_up(batch, 8)
    else:
        tb = min(tb_max, _round_up(pl.cdiv(batch, 2), 128))
    num_tiles = pl.cdiv(batch, tb)                # tail block partially valid

    flops = 2 * batch * (dim * hp + hp * k2 + k2)
    bytes_accessed = 4 * (batch * dim + batch + dim * hp + hp
                          + hp * k2 + 2 * k2 + 1)
    cost = pl.CostEstimate(flops=flops, transcendentals=0,
                           bytes_accessed=bytes_accessed)

    out = pl.pallas_call(
        _mlp_kernel,
        out_shape=jax.ShapeDtypeStruct((batch, 1), f32),
        grid=(num_tiles,),
        in_specs=[
            pl.BlockSpec((tb, dim), lambda i: (i, 0)),      # x: tiled over batch
            pl.BlockSpec((dim, hp), lambda i: (0, 0)),      # w1 (VMEM-resident)
            pl.BlockSpec((1, hp), lambda i: (0, 0)),        # b1
            pl.BlockSpec((hp, k2), lambda i: (0, 0)),       # w2
            pl.BlockSpec((2, k2), lambda i: (0, 0)),        # [b2 ; w3-row]
            pl.BlockSpec((1, 1), lambda i: (0, 0),
                         memory_space=pltpu.MemorySpace.SMEM),  # b3 scalar
        ],
        out_specs=pl.BlockSpec((tb, 1), lambda i: (i, 0)),  # batch-on-sublanes
        compiler_params=pltpu.CompilerParams(
            dimension_semantics=("parallel",)),
        cost_estimate=cost,
    )(x.astype(f32), prepared["w1p"], prepared["b1p"], prepared["w2p"],
      prepared["b2w3"], prepared["b3p"])

    return out


def init_params(key, dim, hidden_size=100):
    """Deterministic init mimicking PyTorch nn.Linear (uniform +/- 1/sqrt(fan_in)).

    Weights stored as (in_features, out_features); biases as (1, out)."""
    keys = jax.random.split(key, 6)

    def linear(kw, kb, fan_in, fan_out):
        bound = 1.0 / jnp.sqrt(jnp.float32(fan_in))
        w = jax.random.uniform(kw, (fan_in, fan_out), jnp.float32, -bound, bound)
        b = jax.random.uniform(kb, (1, fan_out), jnp.float32, -bound, bound)
        return w, b

    w1, b1 = linear(keys[0], keys[1], dim, hidden_size)
    w2, b2 = linear(keys[2], keys[3], hidden_size, 32)
    w3, b3 = linear(keys[4], keys[5], 32, 1)
    return {"w1": w1, "b1": b1, "w2": w2, "b2": b2, "w3": w3, "b3": b3}


if __name__ == "__main__":
    key = jax.random.PRNGKey(0)
    k_x, k_p, k_x2 = jax.random.split(key, 3)

    # Small shapes consistent with Network(dim, hidden_size=100).
    batch, dim, hidden = 8, 16, 100
    x = jax.random.normal(k_x, (batch, dim), dtype=jnp.float32)
    params = init_params(k_p, dim, hidden)
    prepared = prepare_params(params)     # pad/pack weights once, reuse

    def ref_fwd(xv):
        h = jnp.maximum(xv @ params["w1"] + params["b1"], 0.0)
        h = jnp.maximum(h @ params["w2"] + params["b2"], 0.0)
        return h @ params["w3"] + params["b3"]

    # Single-tile path (hidden 100 -> 128 padding, unpadded feature dim).
    out = jax.block_until_ready(network_forward(x, prepared))
    assert out.shape == (batch, 1)
    assert jnp.allclose(out, ref_fwd(x), atol=1e-5, rtol=1e-5)

    # Multi-tile path with a partial tail block (grid of 3, parallel batch axis).
    batch2 = 300
    x2 = jax.random.normal(k_x2, (batch2, dim), dtype=jnp.float32)
    out2 = jax.block_until_ready(network_forward(x2, prepared, tb_max=128))
    assert out2.shape == (batch2, 1)
    assert jnp.allclose(out2, ref_fwd(x2), atol=1e-5, rtol=1e-5)

    print("KERNEL_OK")
</pallas_src>

<mosaic_0001>
module attributes {stable_mosaic.version = 11 : i64} {
  func.func @_mlp_kernel(%arg0: i32, %arg1: memref<8x16xf32, #tpu.memory_space<vmem>>, %arg2: memref<16x128xf32, #tpu.memory_space<vmem>>, %arg3: memref<1x128xf32, #tpu.memory_space<vmem>>, %arg4: memref<128x32xf32, #tpu.memory_space<vmem>>, %arg5: memref<2x32xf32, #tpu.memory_space<vmem>>, %arg6: memref<1x1xf32, #tpu.memory_space<smem>>, %arg7: memref<8x1xf32, #tpu.memory_space<vmem>>) attributes {dimension_semantics = [#tpu.dimension_semantics<parallel>], iteration_bounds = array<i64: 1>, scalar_prefetch = 0 : i64, scratch_operands = 0 : i64, tpu.core_type = #tpu.core_type<tc>, window_params = [{transform_indices = @transform_0, window_bounds = array<i64: 8, 16>}, {pipeline_mode = #tpu.pipeline_mode<synchronous>, transform_indices = @transform_1, window_bounds = array<i64: 16, 128>}, {pipeline_mode = #tpu.pipeline_mode<synchronous>, transform_indices = @transform_2, window_bounds = array<i64: 1, 128>}, {pipeline_mode = #tpu.pipeline_mode<synchronous>, transform_indices = @transform_3, window_bounds = array<i64: 128, 32>}, {pipeline_mode = #tpu.pipeline_mode<synchronous>, transform_indices = @transform_4, window_bounds = array<i64: 2, 32>}, {transform_indices = @transform_5, window_bounds = array<i64: 1, 1>}, {transform_indices = @transform_6, window_bounds = array<i64: 8, 1>}]} {
    %c0 = arith.constant 0 : index
    %c0_0 = arith.constant 0 : index
    %0 = vector.load %arg1[%c0, %c0_0] : memref<8x16xf32, #tpu.memory_space<vmem>>, vector<8x16xf32>
    %c0_1 = arith.constant 0 : index
    %c0_2 = arith.constant 0 : index
    %1 = vector.load %arg2[%c0_1, %c0_2] : memref<16x128xf32, #tpu.memory_space<vmem>>, vector<16x128xf32>
    %cst = arith.constant dense<0.000000e+00> : vector<8x128xf32>
    %2 = tpu.matmul %0, %1, %cst {dimension_numbers = #tpu.dot_dimension_numbers<[1], [0], [0], [1], [0, 0, 1, 1], [], []>} : vector<8x16xf32>, vector<16x128xf32>, vector<8x128xf32> -> vector<8x128xf32>
    %c0_3 = arith.constant 0 : index
    %c0_4 = arith.constant 0 : index
    %3 = vector.load %arg3[%c0_3, %c0_4] : memref<1x128xf32, #tpu.memory_space<vmem>>, vector<1x128xf32>
    %4 = vector.broadcast %3 : vector<1x128xf32> to vector<8x128xf32>
    %5 = arith.addf %2, %4 : vector<8x128xf32>
    %cst_5 = arith.constant 0.000000e+00 : f32
    %6 = vector.broadcast %cst_5 : f32 to vector<8x128xf32>
    %7 = arith.maximumf %5, %6 : vector<8x128xf32>
    %c0_6 = arith.constant 0 : index
    %c0_7 = arith.constant 0 : index
    %8 = vector.load %arg4[%c0_6, %c0_7] : memref<128x32xf32, #tpu.memory_space<vmem>>, vector<128x32xf32>
    %cst_8 = arith.constant dense<0.000000e+00> : vector<8x32xf32>
    %9 = tpu.matmul %7, %8, %cst_8 {dimension_numbers = #tpu.dot_dimension_numbers<[1], [0], [0], [1], [0, 0, 1, 1], [], []>} : vector<8x128xf32>, vector<128x32xf32>, vector<8x32xf32> -> vector<8x32xf32>
    %c0_9 = arith.constant 0 : index
    %c0_10 = arith.constant 0 : index
    %10 = vector.load %arg5[%c0_9, %c0_10] : memref<2x32xf32, #tpu.memory_space<vmem>>, vector<1x32xf32>
    %11 = vector.broadcast %10 : vector<1x32xf32> to vector<8x32xf32>
    %12 = arith.addf %9, %11 : vector<8x32xf32>
    %cst_11 = arith.constant 0.000000e+00 : f32
    %13 = vector.broadcast %cst_11 : f32 to vector<8x32xf32>
    %14 = arith.maximumf %12, %13 : vector<8x32xf32>
    %c1 = arith.constant 1 : index
    %c0_12 = arith.constant 0 : index
    %15 = vector.load %arg5[%c1, %c0_12] : memref<2x32xf32, #tpu.memory_space<vmem>>, vector<1x32xf32>
    %16 = vector.broadcast %15 : vector<1x32xf32> to vector<8x32xf32>
    %17 = arith.mulf %14, %16 : vector<8x32xf32>
    %cst_13 = arith.constant dense<0.000000e+00> : vector<8xf32>
    %18 = vector.multi_reduction <add>, %17, %cst_13 [1] : vector<8x32xf32> to vector<8xf32>
    %19 = vector.shape_cast %18 : vector<8xf32> to vector<8x1xf32>
    %c0_14 = arith.constant 0 : index
    %c0_15 = arith.constant 0 : index
    %20 = memref.load %arg6[%c0_14, %c0_15] : memref<1x1xf32, #tpu.memory_space<smem>>
    %21 = vector.broadcast %20 : f32 to vector<8x1xf32>
    %22 = arith.addf %19, %21 : vector<8x1xf32>
    %c0_16 = arith.constant 0 : index
    %c0_17 = arith.constant 0 : index
    %23 = vector.load %arg7[%c0_16, %c0_17] : memref<8x1xf32, #tpu.memory_space<vmem>>, vector<8x1xf32>
    tpu.vector_store %arg7[%c0_16, %c0_17], %22 {strides = array<i32>} : memref<8x1xf32, #tpu.memory_space<vmem>>, vector<8x1xf32>,
    return
  }
  func.func @transform_0(%arg0: i32) -> (i32, i32) {
    %c0_i32 = arith.constant 0 : i32
    %c0_i32_0 = arith.constant 0 : i32
    return %arg0, %c0_i32 : i32, i32
  }
  func.func @transform_1(%arg0: i32) -> (i32, i32) {
    %c0_i32 = arith.constant 0 : i32
    %c0_i32_0 = arith.constant 0 : i32
    %c0_i32_1 = arith.constant 0 : i32
    return %c0_i32, %c0_i32_0 : i32, i32
  }
  func.func @transform_2(%arg0: i32) -> (i32, i32) {
    %c0_i32 = arith.constant 0 : i32
    %c0_i32_0 = arith.constant 0 : i32
    %c0_i32_1 = arith.constant 0 : i32
    return %c0_i32, %c0_i32_0 : i32, i32
  }
  func.func @transform_3(%arg0: i32) -> (i32, i32) {
    %c0_i32 = arith.constant 0 : i32
    %c0_i32_0 = arith.constant 0 : i32
    %c0_i32_1 = arith.constant 0 : i32
    return %c0_i32, %c0_i32_0 : i32, i32
  }
  func.func @transform_4(%arg0: i32) -> (i32, i32) {
    %c0_i32 = arith.constant 0 : i32
    %c0_i32_0 = arith.constant 0 : i32
    %c0_i32_1 = arith.constant 0 : i32
    return %c0_i32, %c0_i32_0 : i32, i32
  }
  func.func @transform_5(%arg0: i32) -> (i32, i32) {
    %c0_i32 = arith.constant 0 : i32
    %c0_i32_0 = arith.constant 0 : i32
    %c0_i32_1 = arith.constant 0 : i32
    return %c0_i32, %c0_i32_0 : i32, i32
  }
  func.func @transform_6(%arg0: i32) -> (i32, i32) {
    %c0_i32 = arith.constant 0 : i32
    %c0_i32_0 = arith.constant 0 : i32
    return %arg0, %c0_i32 : i32, i32
  }
}

</mosaic_0001>

<bundles_post_ra>
// kernel: tpu_custom_call.1
= control target key start
LH: loop header
LB: loop body
LE: loop exit
PB: predicated region body
PF: predicated region fallthrough
CT: control target
= control target key end

     0   :  { %vm31_vm0 = vcmask 130048   ;;  %vm98_vm1 = vcmask 261120   ;;  %vm105_vm2 = vcmask 7168   ;;  %s222_s1 = inlined_call_operand.vmem [shape: f32[16,128], index: 1, kind: input, shape index: {}]   ;;  %s223_s0 = inlined_call_operand.vmem [shape: f32[8,16], index: 0, kind: input, shape index: {}]   ;;  %s224_s3 = inlined_call_operand.vmem [shape: f32[128,32], index: 3, kind: input, shape index: {}]   ;;  %s225_s2 = inlined_call_operand.vmem [shape: f32[1,128], index: 2, kind: input, shape index: {}]   ;;  %s226_s4 = inlined_call_operand.vmem [shape: f32[2,32], index: 4, kind: input, shape index: {}]   ;;  %s227_s5 = inlined_call_operand.<no memory space> [shape: f32[1,1], index: 5, kind: input, shape index: {}]   ;;  %s228_s6 = inlined_call_operand.vmem [shape: f32[8,1], index: 6, kind: output, shape index: {}]  }
   0x1   :  { %v26_v0 = vld [vmem:[%s222_s1 + $0x8] sm:$0xff]  ;;  %v25_v1 = vld [vmem:[%s222_s1] sm:$0xff]  ;;  %v71_v3 = vld [vmem:[%s224_s3 + $0x78] sm:$0xff]  ;;  %v103_v30 = vstv %s227_s5 }
   0x2   :  { %49 = vmatpush.msra.mxu0 %v26_v0  ;;  %v24_v2 = vld [vmem:[%s223_s0] sm:$0xff]  ;;  %v70_v4 = vld [vmem:[%s224_s3 + $0x70] sm:$0xff]  ;;  %74 = vmatpush.msra.mxu1 %v71_v3  ;;  %v69_v5 = vld [vmem:[%s224_s3 + $0x68] sm:$0xff] }
   0x3   :  { %v68_v6 = vld [vmem:[%s224_s3 + $0x60] sm:$0xff]  ;;  %v67_v7 = vld [vmem:[%s224_s3 + $0x58] sm:$0xff]  ;;  %v66_v8 = vld [vmem:[%s224_s3 + $0x50] sm:$0xff] }
   0x4   :  { %50 = vmatpush.msra.mxu0 %v25_v1  ;;  %75 = vmatpush.msra.mxu1 %v70_v4  ;;  %v65_v9 = vld [vmem:[%s224_s3 + $0x48] sm:$0xff]  ;;  %v64_v10 = vld [vmem:[%s224_s3 + $0x40] sm:$0xff]  ;;  %v63_v11 = vld [vmem:[%s224_s3 + $0x38] sm:$0xff] }
   0x5   :  { %111 = vmatmul.msk.f32.vlgmr.msra.gmra.mxu0 %vm31_vm0, %v24_v2  ;;  %v62_v12 = vld [vmem:[%s224_s3 + $0x30] sm:$0xff]  ;;  %v61_v13 = vld [vmem:[%s224_s3 + $0x28] sm:$0xff]  ;;  %v60_v14 = vld [vmem:[%s224_s3 + $0x20] sm:$0xff] }
   0x6   :  { %76 = vmatpush.msra.mxu1 %v69_v5  ;;  %v59_v15 = vld [vmem:[%s224_s3 + $0x18] sm:$0xff]  ;;  %v58_v16 = vld [vmem:[%s224_s3 + $0x10] sm:$0xff]  ;;  %v57_v17 = vld [vmem:[%s224_s3 + $0x8] sm:$0xff] }
   0x7   :  { %v56_v18 = vld [vmem:[%s224_s3] sm:$0xff] }
   0x8   :  { %77 = vmatpush.msra.mxu1 %v68_v6  ;;  %v112_v19 = vld [vmem:[%s225_s2] ss:$0 sm:$0xff]  ;;  %v114_v26 = vld [vmem:[%s226_s4 + $0x1] ss:$0 sm:$0xff] }
   0x9   :  { %v113_v23 = vld [vmem:[%s226_s4] ss:$0 sm:$0xff] }
   0xa   :  { %78 = vmatpush.msra.mxu1 %v67_v7 }
   0xc   :  { %79 = vmatpush.msra.mxu1 %v66_v8 }
   0xe   :  { %80 = vmatpush.msra.mxu1 %v65_v9 }
  0x10   :  { %81 = vmatpush.msra.mxu1 %v64_v10 }
  0x12   :  { %82 = vmatpush.msra.mxu1 %v63_v11 }
  0x14   :  { %83 = vmatpush.msra.mxu1 %v62_v12 }
  0x16   :  { %84 = vmatpush.msra.mxu1 %v61_v13 }
  0x18   :  { %85 = vmatpush.msra.mxu1 %v60_v14 }
  0x1a   :  { %86 = vmatpush.msra.mxu1 %v59_v15 }
  0x1c   :  { %87 = vmatpush.msra.mxu1 %v58_v16 }
  0x1e   :  { %88 = vmatpush.msra.mxu1 %v57_v17 }
  0x20   :  { %89 = vmatpush.msra.mxu1 %v56_v18 }
  0x82   :  { %v52_v20 = vpop.f32.mrf.mxu0 }
  0x83   :  { %v53_v21 = vadd.f32 %v112_v19, %v52_v20 }
  0x85   :  { %v55_v22 = vmax.f32 %v53_v21, 0.0 }
  0x87   :  { %90 = vmatmul.f32.vlgmr.msra.gmra.mxu1 %v55_v22 }
 0x104   :  { %v91_v24 = vpop.f32.mrf.mxu1 }
 0x105   :  { %v92_v25 = vadd.f32 %v113_v23, %v91_v24 }
 0x107   :  { %v94_v27 = vmax.f32 %v92_v25, 0.0 }
 0x109   :  { %v97_v28 = vmul.f32 %v114_v26, %v94_v27 }
 0x10b   :  { %v99_v29 = vsel %vm98_vm1, %v97_v28, 0.0 }
 0x10c   :  { %100 = vadd.xlane.f32.xlu0 %v99_v29 }
 0x17f   :  { %v101_v31 = vpop.xlane.xlu0 %100 }
 0x180   :  { %v104_v32 = vadd.f32 %v103_v30, %v101_v31 }
 0x182   :  { %106 = vst.msk [vmem:[%s228_s6] sm:$0xff] %vm105_vm2, %v104_v32 }

</bundles_post_ra>
